<compile_context>
chip_gen: v7x
topology: tpu7x:2x2x1
jax: 0.10.0
libtpu: 0.0.40
codegen_flags: <defaults>
</compile_context>

<pallas_src>
import functools
import math

import jax
import jax.numpy as jnp
from jax.experimental import pallas as pl
from jax.experimental.pallas import tpu as pltpu


# ----------------------------------------------------------------------------
# helpers
# ----------------------------------------------------------------------------
def _gelu(x):
    # tanh-approx gelu (matches BERT-style `gelu` in the module)
    return 0.5 * x * (1.0 + jnp.tanh(0.7978845608028654 * (x + 0.044715 * x * x * x)))


def _pick_tile(dim, target, align):
    """Largest tile <= target that divides dim and is a multiple of `align`;
    falls back to the full dim (always legal as a block shape)."""
    if dim <= target or dim % align != 0:
        return dim
    t = (target // align) * align
    while t >= align:
        if dim % t == 0:
            return t
        t -= align
    return dim


# ----------------------------------------------------------------------------
# Tiled fused linear:  y = act(x @ W + b)   (bf16 operands, f32 accumulation)
# ----------------------------------------------------------------------------
def _linear_kernel(x_ref, w_ref, b_ref, o_ref, acc_ref, *, act):
    @pl.when(pl.program_id(2) == 0)
    def _():
        acc_ref[...] = jnp.zeros_like(acc_ref)

    acc_ref[...] += jnp.dot(x_ref[...], w_ref[...],
                            preferred_element_type=jnp.float32)

    @pl.when(pl.program_id(2) == pl.num_programs(2) - 1)
    def _():
        y = acc_ref[...] + b_ref[...]
        if act == "gelu":
            y = _gelu(y)
        elif act == "tanh":
            y = jnp.tanh(y)
        o_ref[...] = y.astype(o_ref.dtype)


def linear(x, w, b, act="none", out_dtype=jnp.bfloat16):
    M, K = x.shape
    N = w.shape[1]
    x = x.astype(jnp.bfloat16)
    w = w.astype(jnp.bfloat16)
    b = b.astype(jnp.float32)

    tm = _pick_tile(M, 256, 8)
    tn = _pick_tile(N, 512, 128)
    tk = _pick_tile(K, 512, 128)

    return pl.pallas_call(
        functools.partial(_linear_kernel, act=act),
        out_shape=jax.ShapeDtypeStruct((M, N), out_dtype),
        grid=(M // tm, N // tn, K // tk),
        in_specs=[
            pl.BlockSpec((tm, tk), lambda i, j, k: (i, k)),
            pl.BlockSpec((tk, tn), lambda i, j, k: (k, j)),
            pl.BlockSpec((1, tn), lambda i, j, k: (0, j)),
        ],
        out_specs=pl.BlockSpec((tm, tn), lambda i, j, k: (i, j)),
        scratch_shapes=[pltpu.VMEM((tm, tn), jnp.float32)],
        compiler_params=pltpu.CompilerParams(
            dimension_semantics=("parallel", "parallel", "arbitrary"),
            vmem_limit_bytes=32 * 1024 * 1024,
        ),
    )(x, w, b)


# ----------------------------------------------------------------------------
# LayerNorm (optionally fused with a residual add), tiled over rows
# ----------------------------------------------------------------------------
def _ln_kernel(*refs, eps, has_residual):
    if has_residual:
        x_ref, r_ref, g_ref, b_ref, o_ref = refs
    else:
        x_ref, g_ref, b_ref, o_ref = refs
    x = x_ref[...].astype(jnp.float32)
    if has_residual:
        x = x + r_ref[...].astype(jnp.float32)
    mu = jnp.mean(x, axis=-1, keepdims=True)
    xc = x - mu
    var = jnp.mean(xc * xc, axis=-1, keepdims=True)
    y = xc * jax.lax.rsqrt(var + eps)
    y = y * g_ref[...].astype(jnp.float32) + b_ref[...].astype(jnp.float32)
    o_ref[...] = y.astype(o_ref.dtype)


def layernorm(x, g, b, residual=None, eps=1e-12, out_dtype=jnp.bfloat16):
    M, H = x.shape
    tm = _pick_tile(M, 1024, 8)
    has_res = residual is not None

    in_specs = [pl.BlockSpec((tm, H), lambda i: (i, 0))]
    args = [x]
    if has_res:
        in_specs.append(pl.BlockSpec((tm, H), lambda i: (i, 0)))
        args.append(residual)
    in_specs += [pl.BlockSpec((1, H), lambda i: (0, 0)),
                 pl.BlockSpec((1, H), lambda i: (0, 0))]
    args += [g, b]

    return pl.pallas_call(
        functools.partial(_ln_kernel, eps=eps, has_residual=has_res),
        out_shape=jax.ShapeDtypeStruct((M, H), out_dtype),
        grid=(M // tm,),
        in_specs=in_specs,
        out_specs=pl.BlockSpec((tm, H), lambda i: (i, 0)),
        compiler_params=pltpu.CompilerParams(
            dimension_semantics=("parallel",)),
    )(*args)


# ----------------------------------------------------------------------------
# Multi-head attention (per batch, all heads), lane-dense [B, S, H] output
# ----------------------------------------------------------------------------
def _attn_kernel(q_ref, k_ref, v_ref, bias_ref, o_ref, *, scale, nH):
    bias = bias_ref[0]                                # (1, S) additive mask bias
    outs = []
    for h in range(nH):                               # static unroll over heads
        q = q_ref[0, h]                               # (S, dh) bf16
        k = k_ref[0, h]
        v = v_ref[0, h]
        # q @ k^T without materializing a transpose
        s = jax.lax.dot_general(q, k, (((1,), (1,)), ((), ())),
                                preferred_element_type=jnp.float32) * scale
        s = s + bias                                  # broadcast over query axis
        m = jnp.max(s, axis=-1, keepdims=True)
        p = jnp.exp(s - m)
        denom = jnp.sum(p, axis=-1, keepdims=True)
        p = p * pl.reciprocal(denom, approx=True)
        outs.append(jnp.dot(p.astype(jnp.bfloat16), v,
                            preferred_element_type=jnp.float32))
    # concatenate heads along lanes -> lane-dense (S, H) store
    o_ref[0] = jnp.concatenate(outs, axis=-1).astype(o_ref.dtype)


def attention(q, k, v, bias):
    # q, k, v: [B, nH, S, dh] bf16 ; bias: [B, 1, S] f32 additive mask bias
    B, nH, S, dh = q.shape
    H = nH * dh
    scale = 1.0 / math.sqrt(dh)
    return pl.pallas_call(
        functools.partial(_attn_kernel, scale=scale, nH=nH),
        out_shape=jax.ShapeDtypeStruct((B, S, H), jnp.bfloat16),
        grid=(B,),
        in_specs=[
            pl.BlockSpec((1, nH, S, dh), lambda b: (b, 0, 0, 0)),
            pl.BlockSpec((1, nH, S, dh), lambda b: (b, 0, 0, 0)),
            pl.BlockSpec((1, nH, S, dh), lambda b: (b, 0, 0, 0)),
            pl.BlockSpec((1, 1, S), lambda b: (b, 0, 0)),
        ],
        out_specs=pl.BlockSpec((1, S, H), lambda b: (b, 0, 0)),
        compiler_params=pltpu.CompilerParams(
            dimension_semantics=("parallel",)),
    )(q, k, v, bias)


# ----------------------------------------------------------------------------
# batched_index_select as a clamped one-hot MXU matmul:
#   out[b, t, :] = x[b, idx[b, t], :]
# ----------------------------------------------------------------------------
def _gather_kernel(idx_ref, x_ref, o_ref):
    S = x_ref.shape[1]
    idx = idx_ref[0]                                   # (T, 1) int32
    idx = jnp.clip(idx, 0, S - 1)                      # safety: no OOB reads
    T = idx.shape[0]
    col = jax.lax.broadcasted_iota(jnp.int32, (T, S), 1)
    onehot = (col == idx).astype(jnp.bfloat16)         # (T, S)
    x = x_ref[0].astype(jnp.bfloat16)                  # (S, H)
    o_ref[0] = jnp.dot(onehot, x,
                       preferred_element_type=jnp.float32).astype(o_ref.dtype)


def batched_index_select(x, idx):
    B, S, H = x.shape
    T = idx.shape[1]
    idx3 = idx.astype(jnp.int32).reshape(B, T, 1)
    return pl.pallas_call(
        _gather_kernel,
        out_shape=jax.ShapeDtypeStruct((B, T, H), x.dtype),
        grid=(B,),
        in_specs=[
            pl.BlockSpec((1, T, 1), lambda b: (b, 0, 0)),
            pl.BlockSpec((1, S, H), lambda b: (b, 0, 0)),
        ],
        out_specs=pl.BlockSpec((1, T, H), lambda b: (b, 0, 0)),
        compiler_params=pltpu.CompilerParams(
            dimension_semantics=("parallel",)),
    )(idx3, x)


# ----------------------------------------------------------------------------
# Parameter construction (deterministic, synthetic "pretrained" weights)
# ----------------------------------------------------------------------------
def init_params(key, vocab_size, n_segments, max_pos, H, nH, F, out_size):
    keys = jax.random.split(key, 20)
    s = 0.02

    def nrm(k, shape):
        return (s * jax.random.normal(k, shape)).astype(jnp.float32)

    p = {
        "tok_emb": nrm(keys[0], (vocab_size, H)),
        "seg_emb": nrm(keys[1], (n_segments, H)),
        "pos_emb": nrm(keys[2], (max_pos, H)),
        "emb_ln_g": jnp.ones((1, H), jnp.float32),
        "emb_ln_b": jnp.zeros((1, H), jnp.float32),
        # transformer layer (fused QKV)
        "w_qkv": nrm(keys[3], (H, 3 * H)),
        "b_qkv": jnp.zeros((1, 3 * H), jnp.float32),
        "wo": nrm(keys[6], (H, H)), "bo": jnp.zeros((1, H), jnp.float32),
        "ln1_g": jnp.ones((1, H), jnp.float32), "ln1_b": jnp.zeros((1, H), jnp.float32),
        "w1": nrm(keys[7], (H, F)), "b1": jnp.zeros((1, F), jnp.float32),
        "w2": nrm(keys[8], (F, H)), "b2": jnp.zeros((1, H), jnp.float32),
        "ln2_g": jnp.ones((1, H), jnp.float32), "ln2_b": jnp.zeros((1, H), jnp.float32),
        # BERT pooler (tanh)
        "wp": nrm(keys[9], (H, H)), "bp": jnp.zeros((1, H), jnp.float32),
        # BertLinear output projection to cfg.bert_output_size (gelu)
        "w_out": nrm(keys[10], (H, out_size)),
        "b_out": jnp.zeros((1, out_size), jnp.float32),
    }
    return p


# ----------------------------------------------------------------------------
# PretrainedEmbedModel.forward
# ----------------------------------------------------------------------------
def pretrained_embed_model_forward(params, batch_inputs, *, nH, rel_mlp=False):
    tokens = batch_inputs["wordpiece_tokens"]                       # [B, S] int32
    segments = batch_inputs.get("wordpiece_segment_ids",
                                jnp.zeros_like(tokens))             # [B, S] int32
    B, S = tokens.shape
    H = params["tok_emb"].shape[1]
    dh = H // nH

    # --- embeddings (table lookups are glue; LN is a Pallas kernel) ---------
    x = (jnp.take(params["tok_emb"], tokens, axis=0)
         + jnp.take(params["seg_emb"], segments, axis=0)
         + params["pos_emb"][None, :S, :])                          # [B, S, H] f32
    x2d = layernorm(x.reshape(B * S, H),
                    params["emb_ln_g"], params["emb_ln_b"])         # [B*S, H] bf16

    # additive attention mask bias, kept compact: [B, 1, S]
    attn_bias = (((tokens != 0).astype(jnp.float32) - 1.0) * 1e9)[:, None, :]

    # --- single transformer encoder layer -----------------------------------
    qkv = linear(x2d, params["w_qkv"], params["b_qkv"])             # [B*S, 3H] bf16
    qkv = qkv.reshape(B, S, 3, nH, dh).transpose(2, 0, 3, 1, 4)      # [3, B, nH, S, dh]
    q, k, v = qkv[0], qkv[1], qkv[2]

    a = attention(q, k, v, attn_bias)                               # [B, S, H] bf16
    a2d = linear(a.reshape(B * S, H), params["wo"], params["bo"])   # [B*S, H] bf16
    x2d = layernorm(a2d, params["ln1_g"], params["ln1_b"], residual=x2d)

    f = linear(x2d, params["w1"], params["b1"], act="gelu")         # [B*S, F] bf16
    f = linear(f, params["w2"], params["b2"])                       # [B*S, H] bf16
    x2d = layernorm(f, params["ln2_g"], params["ln2_b"], residual=x2d)

    seq_output = x2d.reshape(B, S, H)                               # [B, S, H] bf16

    # --- BERT pooler: tanh(W_p * seq_output[:, 0, :] + b_p) -----------------
    cls_tok = seq_output[:, 0, :]                                   # [B, H] bf16
    pooled = linear(cls_tok, params["wp"], params["bp"], act="tanh")  # [B, H] bf16

    # --- output projection (gelu); gather BEFORE projecting, pooler fused ---
    out_size = params["w_out"].shape[1]
    if not rel_mlp:
        idx = batch_inputs["wordpiece_tokens_index"]                # [B, T] int32
        T = idx.shape[1]
        gathered = batched_index_select(seq_output, idx)            # [B, T, H] bf16
        proj_in = jnp.concatenate([gathered.reshape(B * T, H), pooled], axis=0)
        proj = linear(proj_in, params["w_out"], params["b_out"],
                      act="gelu", out_dtype=jnp.float32)            # [B*T+B, out]
        batch_inputs["seq_encoder_reprs"] = proj[:B * T].reshape(B, T, out_size)
        batch_inputs["seq_cls_repr"] = proj[B * T:]
    else:
        proj_in = jnp.concatenate([seq_output.reshape(B * S, H), pooled], axis=0)
        proj = linear(proj_in, params["w_out"], params["b_out"],
                      act="gelu", out_dtype=jnp.float32)            # [B*S+B, out]
        batch_inputs["seq_encoder_reprs"] = proj[:B * S].reshape(B, S, out_size)
        batch_inputs["seq_cls_repr"] = proj[B * S:]
    return batch_inputs


# ----------------------------------------------------------------------------
if __name__ == "__main__":
    # small, module-consistent shapes
    B, S, T = 2, 8, 8
    H, nH, F = 32, 4, 64
    VOCAB, N_SEG, MAX_POS = 64, 2, 64
    OUT_SIZE = 64  # cfg.bert_output_size

    key = jax.random.PRNGKey(0)
    k_param, k_tok, k_seg, k_idx = jax.random.split(key, 4)

    params = init_params(k_param, VOCAB, N_SEG, MAX_POS, H, nH, F, OUT_SIZE)

    batch_inputs = {
        "wordpiece_tokens": jax.random.randint(k_tok, (B, S), 1, VOCAB, dtype=jnp.int32),
        "wordpiece_segment_ids": jax.random.randint(k_seg, (B, S), 0, N_SEG, dtype=jnp.int32),
        "wordpiece_tokens_index": jax.random.randint(k_idx, (B, T), 0, S, dtype=jnp.int32),
    }

    out = pretrained_embed_model_forward(params, dict(batch_inputs), nH=nH, rel_mlp=False)
    seq_encoder_reprs = jax.block_until_ready(out["seq_encoder_reprs"])
    seq_cls_repr = jax.block_until_ready(out["seq_cls_repr"])

    assert seq_encoder_reprs.shape == (B, T, OUT_SIZE)
    assert seq_cls_repr.shape == (B, OUT_SIZE)
    assert bool(jnp.all(jnp.isfinite(seq_encoder_reprs)))
    assert bool(jnp.all(jnp.isfinite(seq_cls_repr)))
    print("KERNEL_OK")
</pallas_src>

<mosaic_0001>
module attributes {stable_mosaic.version = 11 : i64} {
  func.func @_ln_kernel(%arg0: i32, %arg1: memref<16x32xf32, #tpu.memory_space<vmem>>, %arg2: memref<1x32xf32, #tpu.memory_space<vmem>>, %arg3: memref<1x32xf32, #tpu.memory_space<vmem>>, %arg4: memref<16x32xbf16, #tpu.memory_space<vmem>>) attributes {dimension_semantics = [#tpu.dimension_semantics<parallel>], iteration_bounds = array<i64: 1>, scalar_prefetch = 0 : i64, scratch_operands = 0 : i64, tpu.core_type = #tpu.core_type<tc>, window_params = [{transform_indices = @transform_0, window_bounds = array<i64: 16, 32>}, {pipeline_mode = #tpu.pipeline_mode<synchronous>, transform_indices = @transform_1, window_bounds = array<i64: 1, 32>}, {pipeline_mode = #tpu.pipeline_mode<synchronous>, transform_indices = @transform_2, window_bounds = array<i64: 1, 32>}, {transform_indices = @transform_3, window_bounds = array<i64: 16, 32>}]} {
    %c0 = arith.constant 0 : index
    %c0_0 = arith.constant 0 : index
    %0 = vector.load %arg1[%c0, %c0_0] : memref<16x32xf32, #tpu.memory_space<vmem>>, vector<16x32xf32>
    %cst = arith.constant dense<0.000000e+00> : vector<16xf32>
    %1 = vector.multi_reduction <add>, %0, %cst [1] : vector<16x32xf32> to vector<16xf32>
    %2 = vector.shape_cast %1 : vector<16xf32> to vector<16x1xf32>
    %cst_1 = arith.constant 3.200000e+01 : f32
    %3 = vector.broadcast %cst_1 : f32 to vector<16x1xf32>
    %4 = arith.divf %2, %3 : vector<16x1xf32>
    %5 = vector.broadcast %4 : vector<16x1xf32> to vector<16x32xf32>
    %6 = arith.subf %0, %5 : vector<16x32xf32>
    %7 = arith.mulf %6, %6 : vector<16x32xf32>
    %cst_2 = arith.constant dense<0.000000e+00> : vector<16xf32>
    %8 = vector.multi_reduction <add>, %7, %cst_2 [1] : vector<16x32xf32> to vector<16xf32>
    %9 = vector.shape_cast %8 : vector<16xf32> to vector<16x1xf32>
    %cst_3 = arith.constant 3.200000e+01 : f32
    %10 = vector.broadcast %cst_3 : f32 to vector<16x1xf32>
    %11 = arith.divf %9, %10 : vector<16x1xf32>
    %cst_4 = arith.constant 9.99999996E-13 : f32
    %12 = vector.broadcast %cst_4 : f32 to vector<16x1xf32>
    %13 = arith.addf %11, %12 : vector<16x1xf32>
    %14 = math.rsqrt %13 : vector<16x1xf32>
    %15 = vector.broadcast %14 : vector<16x1xf32> to vector<16x32xf32>
    %16 = arith.mulf %6, %15 : vector<16x32xf32>
    %c0_5 = arith.constant 0 : index
    %c0_6 = arith.constant 0 : index
    %17 = vector.load %arg2[%c0_5, %c0_6] : memref<1x32xf32, #tpu.memory_space<vmem>>, vector<1x32xf32>
    %18 = vector.broadcast %17 : vector<1x32xf32> to vector<16x32xf32>
    %19 = arith.mulf %16, %18 : vector<16x32xf32>
    %c0_7 = arith.constant 0 : index
    %c0_8 = arith.constant 0 : index
    %20 = vector.load %arg3[%c0_7, %c0_8] : memref<1x32xf32, #tpu.memory_space<vmem>>, vector<1x32xf32>
    %21 = vector.broadcast %20 : vector<1x32xf32> to vector<16x32xf32>
    %22 = arith.addf %19, %21 : vector<16x32xf32>
    %23 = arith.truncf %22 : vector<16x32xf32> to vector<16x32xbf16>
    %c0_9 = arith.constant 0 : index
    %c0_10 = arith.constant 0 : index
    %24 = vector.load %arg4[%c0_9, %c0_10] : memref<16x32xbf16, #tpu.memory_space<vmem>>, vector<16x32xbf16>
    tpu.vector_store %arg4[%c0_9, %c0_10], %23 {strides = array<i32>} : memref<16x32xbf16, #tpu.memory_space<vmem>>, vector<16x32xbf16>,
    return
  }
  func.func @transform_0(%arg0: i32) -> (i32, i32) {
    %c0_i32 = arith.constant 0 : i32
    %c0_i32_0 = arith.constant 0 : i32
    return %arg0, %c0_i32 : i32, i32
  }
  func.func @transform_1(%arg0: i32) -> (i32, i32) {
    %c0_i32 = arith.constant 0 : i32
    %c0_i32_0 = arith.constant 0 : i32
    %c0_i32_1 = arith.constant 0 : i32
    return %c0_i32, %c0_i32_0 : i32, i32
  }
  func.func @transform_2(%arg0: i32) -> (i32, i32) {
    %c0_i32 = arith.constant 0 : i32
    %c0_i32_0 = arith.constant 0 : i32
    %c0_i32_1 = arith.constant 0 : i32
    return %c0_i32, %c0_i32_0 : i32, i32
  }
  func.func @transform_3(%arg0: i32) -> (i32, i32) {
    %c0_i32 = arith.constant 0 : i32
    %c0_i32_0 = arith.constant 0 : i32
    return %arg0, %c0_i32 : i32, i32
  }
}

</mosaic_0001>

<bundles_post_ra>
// kernel: tpu_custom_call.1
= control target key start
LH: loop header
LB: loop body
LE: loop exit
PB: predicated region body
PF: predicated region fallthrough
CT: control target
= control target key end

     0   :  { %8 = vsyncpa [#allocation3], 0  ;;  %s229_s0 = inlined_call_operand.hbm [shape: f32[16,32], index: 0, kind: input, shape index: {}]   ;;  %s230_s1 = inlined_call_operand.vmem [shape: f32[1,32], index: 1, kind: input, shape index: {}]   ;;  %s231_s2 = inlined_call_operand.vmem [shape: f32[1,32], index: 2, kind: input, shape index: {}]   ;;  %s232_s3 = inlined_call_operand.hbm [shape: bf16[16,32], index: 3, kind: output, shape index: {}]  }
   0x1   :  { %9 = vsyncpa [#allocation4], 0  ;;  %s169_s12 = smov [#allocation2]   ;;  %s121_s16 = scalar_lea.hbm %s229_s0, 256 }
   0x2   :  { %s15_s13 = sshll.u32 %s169_s12, 4  ;;  %p122_p0 = scmp.ne.s32.totalorder %s229_s0, %s121_s16  ;;  %s16_s13 = int_to_ptr.vmem [resolvable:$true] %s15_s13 }
   0x3   :  { %p125_p1 = scmp.lt.u32.totalorder %s121_s16, %s229_s0 }
   0x5   :  { %p127_p2 = pnand %p125_p1, %p122_p0 }
   0x7   :  { %130 = shalt.err (!%p127_p2)
}
   0x8   :  { %s131_s21 = scalar_lea.vmem %s16_s13, 256  ;;  %p136_p4 = scmp.lt.s32.totalorder %s16_s13, %s16_s13 }
   0x9   :  { %p132_p3 = scmp.ne.s32.totalorder %s16_s13, %s131_s21  ;;  %p137_p5 = scmp.lt.s32.totalorder %s131_s21, %s131_s21 }
   0xb   :  { %p138_p6 = por %p137_p5, %p136_p4 }
   0xd   :  { %p139_p7 = pnand %p138_p6, %p132_p3 }
   0xf   :  { %142 = shalt.err (!%p139_p7)
}
  0x10   :  { %s170_s22 = smov 128   ;;  %s171_s23 = smov 8  }
  0x11   :  { %21 = dma.hbm_to_vmem [thread:$0]  %s229_s0, 256, %s16_s13, [#allocation3], %s170_s22, %s170_s22, %s171_s23  }
  0x12   :  { %165 = dma.done.wait [#allocation3], 256  }
  0x13   :  { %166 = vsyncadd [#allocation3], 4294967040  ;;  %vm31_vm0 = vcmask 261120   ;;  %v29_v0 = vld [vmem:[#allocation2] sm:$0xff]  ;;  %v30_v1 = vld [vmem:[#allocation2 + $0x8] sm:$0xff]  ;;  %vm85_vm1 = vcmask 257024  }
  0x14   :  { %v32_v2 = vsel %vm31_vm0, %v29_v0, 0.0  ;;  %v35_v3 = vsel %vm31_vm0, %v30_v1, 0.0  ;;  %v105_v21 = vld [vmem:[%s230_s1] ss:$0 sm:$0xff]  ;;  %s172_s29 = smov [#allocation5]  }
  0x15   :  { %33 = vadd.xlane.f32.xlu0 %v32_v2  ;;  %v106_v23 = vld [vmem:[%s231_s2] ss:$0 sm:$0xff]  ;;  %s93_s30 = sshll.u32 %s172_s29, 4  ;;  %s94_s30 = int_to_ptr.vmem [resolvable:$true] %s93_s30 }
  0x16   :  { %s143_s1 = scalar_lea.vmem %s94_s30, 128  ;;  %p148_p9 = scmp.lt.s32.totalorder %s94_s30, %s94_s30 }
  0x17   :  { %p144_p8 = scmp.ne.s32.totalorder %s94_s30, %s143_s1  ;;  %p149_p10 = scmp.lt.s32.totalorder %s143_s1, %s143_s1 }
  0x19   :  { %36 = vadd.xlane.f32.xlu0 %v35_v3  ;;  %p150_p11 = por %p149_p10, %p148_p9 }
  0x1b   :  { %p151_p12 = pnand %p150_p11, %p144_p8 }
  0xa2   :  { %v34_v4 = vpop.xlane.xlu0 %33 }
  0xa3   :  { %v39_v5 = vmul.f32 0.03125, %v34_v4 }
  0xa5   :  { %v41_v6 = vsub.f32 %v29_v0, %v39_v5 }
  0xa6   :  { %v37_v7 = vpop.xlane.xlu0 %36 }
  0xa7   :  { %v40_v8 = vmul.f32 0.03125, %v37_v7  ;;  %v43_v9 = vmul.f32 %v41_v6, %v41_v6 }
  0xa9   :  { %v42_v10 = vsub.f32 %v30_v1, %v40_v8  ;;  %v45_v11 = vsel %vm31_vm0, %v43_v9, 0.0 }
  0xaa   :  { %46 = vadd.xlane.f32.xlu1 %v45_v11 }
  0xab   :  { %v44_v12 = vmul.f32 %v42_v10, %v42_v10 }
  0xad   :  { %v48_v13 = vsel %vm31_vm0, %v44_v12, 0.0 }
  0xae   :  { %49 = vadd.xlane.f32.xlu1 %v48_v13 }
 0x137   :  { %v47_v14 = vpop.xlane.xlu1 %46 }
 0x138   :  { %v51_v15 = vmul.f32 0.03125, %v47_v14 }
 0x13a   :  { %v53_v16 = vadd.f32 1e-12, %v51_v15 }
 0x13b   :  { %v50_v17 = vpop.xlane.xlu1 %49 }
 0x13c   :  { %117 = vrsqrt.f32 %v53_v16  ;;  %v52_v18 = vmul.f32 0.03125, %v50_v17 }
 0x13e   :  { %v54_v19 = vadd.f32 1e-12, %v52_v18 }
 0x140   :  { %119 = vrsqrt.f32 %v54_v19 }
 0x146   :  { %v118_v20 = vpop.eup %117 }
 0x147   :  { %v57_v22 = vmul.f32 %v118_v20, %v41_v6 }
 0x149   :  { %v66_v24 = vmul.f32 %v105_v21, %v57_v22 }
 0x14a   :  { %v120_v25 = vpop.eup %119 }
 0x14b   :  { %v58_v26 = vmul.f32 %v120_v25, %v42_v10  ;;  %v75_v27 = vadd.f32 %v106_v23, %v66_v24 }
 0x14d   :  { %v67_v28 = vmul.f32 %v105_v21, %v58_v26  ;;  %v109_v29 = vpack.c.bf16 %v75_v27, %v75_v27 }
 0x14f   :  { %v76_v30 = vadd.f32 %v106_v23, %v67_v28  ;;  %86 = vst.msk [vmem:[#allocation5] sm:$0xf] %vm85_vm1, %v109_v29 }
 0x151   :  { %v110_v31 = vpack.c.bf16 %v76_v30, %v76_v30 }
 0x153   :  { %87 = vst.msk [vmem:[#allocation5 + $0x4] sm:$0xf] %vm85_vm1, %v110_v31 }
 0x154   :  { %154 = shalt.err (!%p151_p12)
}
 0x155   :  { %s155_s5 = scalar_lea.hbm %s232_s3, 128 }
 0x156   :  { %p156_p13 = scmp.ne.s32.totalorder %s232_s3, %s155_s5  ;;  %p159_p0 = scmp.lt.u32.totalorder %s155_s5, %s232_s3 }
 0x158   :  { %p161_p1 = pnand %p159_p0, %p156_p13 }
 0x15a   :  { %164 = shalt.err (!%p161_p1)
}
 0x15b   :  { %s173_s10 = smov 64   ;;  %s174_s11 = smov 4  }
 0x15c   :  { %99 = dma.vmem_to_hbm [thread:$0]  %s94_s30, 128, %s232_s3, [#allocation4], %s173_s10, %s173_s10, %s174_s11  }
 0x15d   :  { %167 = dma.done.wait [#allocation4], 128  }
 0x15e   :  { %168 = vsyncadd [#allocation4], 4294967168 }
 0x15f   :  { %103 = vsyncpa [#allocation3], 1 }
 0x160   :  { %104 = vsyncpa [#allocation4], 1 }

</bundles_post_ra>
